<compile_context>
chip_gen: v5e
topology: v5e:2x2
jax: 0.10.0
libtpu: 0.0.40
codegen_flags: <defaults>
</compile_context>

<pallas_src>
import jax
import jax.numpy as jnp
from jax import lax
from jax.experimental import pallas as pl
from jax.experimental.pallas import tpu as pltpu


def _round_up(n, m):
    return ((n + m - 1) // m) * m


def _device_caps():
    """(max batch-tile rows, vmem_limit_bytes or None) for the local TPU generation."""
    try:
        kind = jax.devices()[0].device_kind.lower()
    except Exception:
        kind = ""
    if "v7" in kind:
        # x double-buffer (tile*128 lanes*4B*2) + h temp (~tile*128*4B) ~= 12-14 MiB at 8192.
        return 8192, 48 << 20
    if "v5" in kind or "v6" in kind:
        return 16384, 96 << 20
    # Unknown / older generation: stay conservative, keep the default scoped VMEM.
    return 4096, None


def _choose_tile_b(B, cap):
    """Lane-dense (multiple-of-128) batch tile; >=2 tiles when B permits (megacore)."""
    if B <= 128:
        return 128
    half = _round_up(pl.cdiv(B, 2), 128)
    return max(128, min(cap, half))


def classifier_kernel(x_ref, w1_ref, b1_ref, w2_ref, b2_ref, o_ref):
    # x_ref:  (TB, F)    w1_ref: (F, H)    b1_ref: (1, H)
    # w2_ref: (1, H)     b2_ref: (1,) in SMEM     o_ref: (1, TB)
    x = x_ref[...]

    # Layer 1: MXU matmul with f32 accumulate; bias + ReLU on the VPU.
    h = jnp.dot(x, w1_ref[...], preferred_element_type=jnp.float32) + b1_ref[...]
    h = jnp.maximum(h, 0.0)                                    # (TB, H)

    # Layer 2: contract H of the w2 row against H of h -> (1, TB).  Batch ends
    # up on the lane axis (lane-dense output block, no masked (TB,1) stores).
    z = lax.dot_general(
        w2_ref[...], h,
        dimension_numbers=(((1,), (1,)), ((), ())),
        preferred_element_type=jnp.float32,
    ) + b2_ref[0]                                              # (1, TB)

    # Exact sigmoid (kernel is DMA-bound; exact reciprocal is free here).
    o_ref[...] = (1.0 / (1.0 + jnp.exp(-z))).astype(o_ref.dtype)


def classifier_forward(x, w1, b1, w2, b2, *, tile_b=None):
    """x: [B, F] float32 -> [B] float32 (squeezed, like the PyTorch module).

    w1: (F, H), b1: (1, H), w2: (1, H) row, b2: (1,).
    """
    B, F = x.shape
    H = w1.shape[1]

    cap, vmem_limit = _device_caps()
    if tile_b is None:
        tile_b = _choose_tile_b(B, cap)
    tile_b = max(128, _round_up(tile_b, 128))      # lane-dense output tiles
    n_tiles = pl.cdiv(B, tile_b)                   # partial tail block handled by Pallas

    cost = pl.CostEstimate(
        flops=2 * B * F * H + 2 * B * H,
        transcendentals=B,
        bytes_accessed=B * F * 4 + F * H * 4 + 2 * H * 4 + 4 + B * 4,
    )

    cp_kwargs = dict(dimension_semantics=("parallel",))   # megacore sharding on v7x
    if vmem_limit is not None:
        cp_kwargs["vmem_limit_bytes"] = vmem_limit

    out = pl.pallas_call(
        classifier_kernel,
        out_shape=jax.ShapeDtypeStruct((1, B), jnp.float32),
        grid_spec=pltpu.PrefetchScalarGridSpec(
            num_scalar_prefetch=0,
            grid=(n_tiles,),
            in_specs=[
                pl.BlockSpec((tile_b, F), lambda i: (i, 0)),        # x: streams per tile
                pl.BlockSpec((F, H), lambda i: (0, 0)),             # w1: VMEM-resident
                pl.BlockSpec((1, H), lambda i: (0, 0)),             # b1: VMEM-resident
                pl.BlockSpec((1, H), lambda i: (0, 0)),             # w2 row: VMEM-resident
                pl.BlockSpec(memory_space=pltpu.MemorySpace.SMEM),  # b2 scalar
            ],
            out_specs=pl.BlockSpec((1, tile_b), lambda i: (0, i)),  # lane-dense slab
        ),
        compiler_params=pltpu.CompilerParams(**cp_kwargs),
        cost_estimate=cost,
    )(x, w1, b1, w2, b2)

    # PyTorch .squeeze() on [B, 1] -> [B].
    return out.reshape(B)


def init_params(key, input_size=20, hidden=64):
    """Deterministic init mimicking PyTorch nn.Linear default (uniform +/-1/sqrt(fan_in))."""
    k1, k2, k3, k4 = jax.random.split(key, 4)
    bound1 = 1.0 / jnp.sqrt(input_size)
    bound2 = 1.0 / jnp.sqrt(hidden)
    w1 = jax.random.uniform(k1, (input_size, hidden), jnp.float32, -bound1, bound1)
    b1 = jax.random.uniform(k2, (1, hidden), jnp.float32, -bound1, bound1)
    w2 = jax.random.uniform(k3, (1, hidden), jnp.float32, -bound2, bound2)  # (out=1, in=H)
    b2 = jax.random.uniform(k4, (1,), jnp.float32, -bound2, bound2)
    return w1, b1, w2, b2


def _reference(x, w1, b1, w2, b2):
    h = jnp.maximum(x @ w1 + b1, 0.0)
    return jax.nn.sigmoid(h @ w2.T + b2).reshape(x.shape[0])


if __name__ == "__main__":
    key = jax.random.PRNGKey(0)
    kx, kx2, kp = jax.random.split(key, 3)

    B, F, H = 8, 20, 64
    x = jax.random.normal(kx, (B, F), jnp.float32)
    w1, b1, w2, b2 = init_params(kp, input_size=F, hidden=H)

    # Small batch: single partial block (block rows > B), default tile selection.
    y = classifier_forward(x, w1, b1, w2, b2)
    jax.block_until_ready(y)
    y_ref = _reference(x, w1, b1, w2, b2)
    assert y.shape == (B,)
    assert jnp.allclose(y, y_ref, atol=2e-3), "mismatch vs reference (small batch)"

    # Ragged batch: multi-tile grid with a partial tail block, no wrapper-side pad.
    B2 = 200
    x2 = jax.random.normal(kx2, (B2, F), jnp.float32)
    y2 = classifier_forward(x2, w1, b1, w2, b2)   # default tile -> 128 rows, 2 tiles
    jax.block_until_ready(y2)
    y2_ref = _reference(x2, w1, b1, w2, b2)
    assert y2.shape == (B2,)
    assert jnp.allclose(y2, y2_ref, atol=2e-3), "mismatch vs reference (tiled batch)"

    print("KERNEL_OK")
</pallas_src>

<mosaic_0001>
module attributes {stable_mosaic.version = 11 : i64} {
  func.func @classifier_kernel(%arg0: i32, %arg1: memref<128x20xf32, #tpu.memory_space<vmem>>, %arg2: memref<20x64xf32, #tpu.memory_space<vmem>>, %arg3: memref<1x64xf32, #tpu.memory_space<vmem>>, %arg4: memref<1x64xf32, #tpu.memory_space<vmem>>, %arg5: memref<1xf32, #tpu.memory_space<smem>>, %arg6: memref<1x128xf32, #tpu.memory_space<vmem>>) attributes {dimension_semantics = [#tpu.dimension_semantics<parallel>], iteration_bounds = array<i64: 1>, scalar_prefetch = 0 : i64, scratch_operands = 0 : i64, tpu.core_type = #tpu.core_type<tc>, window_params = [{transform_indices = @transform_0, window_bounds = array<i64: 128, 20>}, {pipeline_mode = #tpu.pipeline_mode<synchronous>, transform_indices = @transform_1, window_bounds = array<i64: 20, 64>}, {pipeline_mode = #tpu.pipeline_mode<synchronous>, transform_indices = @transform_2, window_bounds = array<i64: 1, 64>}, {pipeline_mode = #tpu.pipeline_mode<synchronous>, transform_indices = @transform_3, window_bounds = array<i64: 1, 64>}, {transform_indices = @transform_4, window_bounds = array<i64: 1>}, {transform_indices = @transform_5, window_bounds = array<i64: 1, 128>}]} {
    %c0 = arith.constant 0 : index
    %c0_0 = arith.constant 0 : index
    %0 = vector.load %arg1[%c0, %c0_0] : memref<128x20xf32, #tpu.memory_space<vmem>>, vector<128x20xf32>
    %c0_1 = arith.constant 0 : index
    %c0_2 = arith.constant 0 : index
    %1 = vector.load %arg2[%c0_1, %c0_2] : memref<20x64xf32, #tpu.memory_space<vmem>>, vector<20x64xf32>
    %cst = arith.constant dense<0.000000e+00> : vector<128x64xf32>
    %2 = tpu.matmul %0, %1, %cst {dimension_numbers = #tpu.dot_dimension_numbers<[1], [0], [0], [1], [0, 0, 1, 1], [], []>} : vector<128x20xf32>, vector<20x64xf32>, vector<128x64xf32> -> vector<128x64xf32>
    %c0_3 = arith.constant 0 : index
    %c0_4 = arith.constant 0 : index
    %3 = vector.load %arg3[%c0_3, %c0_4] : memref<1x64xf32, #tpu.memory_space<vmem>>, vector<1x64xf32>
    %4 = vector.broadcast %3 : vector<1x64xf32> to vector<128x64xf32>
    %5 = arith.addf %2, %4 : vector<128x64xf32>
    %cst_5 = arith.constant 0.000000e+00 : f32
    %6 = vector.broadcast %cst_5 : f32 to vector<128x64xf32>
    %7 = arith.maximumf %5, %6 : vector<128x64xf32>
    %c0_6 = arith.constant 0 : index
    %c0_7 = arith.constant 0 : index
    %8 = vector.load %arg4[%c0_6, %c0_7] : memref<1x64xf32, #tpu.memory_space<vmem>>, vector<1x64xf32>
    %cst_8 = arith.constant dense<0.000000e+00> : vector<1x128xf32>
    %9 = tpu.matmul %8, %7, %cst_8 {dimension_numbers = #tpu.dot_dimension_numbers<[1], [1], [0], [0], [0, 0, 1, 0], [], []>} : vector<1x64xf32>, vector<128x64xf32>, vector<1x128xf32> -> vector<1x128xf32>
    %c0_9 = arith.constant 0 : index
    %10 = memref.load %arg5[%c0_9] : memref<1xf32, #tpu.memory_space<smem>>
    %11 = vector.broadcast %10 : f32 to vector<1x128xf32>
    %12 = arith.addf %9, %11 : vector<1x128xf32>
    %cst_10 = arith.constant 0.000000e+00 : f32
    %13 = vector.broadcast %cst_10 : f32 to vector<1x128xf32>
    %14 = arith.subf %13, %12 : vector<1x128xf32>
    %15 = math.exp %14 : vector<1x128xf32>
    %cst_11 = arith.constant 1.000000e+00 : f32
    %16 = vector.broadcast %cst_11 : f32 to vector<1x128xf32>
    %17 = arith.addf %16, %15 : vector<1x128xf32>
    %cst_12 = arith.constant 1.000000e+00 : f32
    %18 = vector.broadcast %cst_12 : f32 to vector<1x128xf32>
    %19 = arith.divf %18, %17 : vector<1x128xf32>
    %c0_13 = arith.constant 0 : index
    %c0_14 = arith.constant 0 : index
    %20 = vector.load %arg6[%c0_13, %c0_14] : memref<1x128xf32, #tpu.memory_space<vmem>>, vector<1x128xf32>
    tpu.vector_store %arg6[%c0_13, %c0_14], %19 {strides = array<i32>} : memref<1x128xf32, #tpu.memory_space<vmem>>, vector<1x128xf32>,
    return
  }
  func.func @transform_0(%arg0: i32) -> (i32, i32) {
    %c0_i32 = arith.constant 0 : i32
    %c0_i32_0 = arith.constant 0 : i32
    return %arg0, %c0_i32 : i32, i32
  }
  func.func @transform_1(%arg0: i32) -> (i32, i32) {
    %c0_i32 = arith.constant 0 : i32
    %c0_i32_0 = arith.constant 0 : i32
    %c0_i32_1 = arith.constant 0 : i32
    return %c0_i32, %c0_i32_0 : i32, i32
  }
  func.func @transform_2(%arg0: i32) -> (i32, i32) {
    %c0_i32 = arith.constant 0 : i32
    %c0_i32_0 = arith.constant 0 : i32
    %c0_i32_1 = arith.constant 0 : i32
    return %c0_i32, %c0_i32_0 : i32, i32
  }
  func.func @transform_3(%arg0: i32) -> (i32, i32) {
    %c0_i32 = arith.constant 0 : i32
    %c0_i32_0 = arith.constant 0 : i32
    %c0_i32_1 = arith.constant 0 : i32
    return %c0_i32, %c0_i32_0 : i32, i32
  }
  func.func @transform_4(%arg0: i32) -> i32 {
    %c0_i32 = arith.constant 0 : i32
    %c0_i32_0 = arith.constant 0 : i32
    return %c0_i32 : i32
  }
  func.func @transform_5(%arg0: i32) -> (i32, i32) {
    %c0_i32 = arith.constant 0 : i32
    %c0_i32_0 = arith.constant 0 : i32
    return %c0_i32, %arg0 : i32, i32
  }
}

</mosaic_0001>

<bundles_post_ra>
// kernel: tpu_custom_call.1
= control target key start
LH: loop header
LB: loop body
LE: loop exit
PB: predicated region body
PF: predicated region fallthrough
CT: control target
= control target key end

     0   :  { %11 = vsyncpa [#allocation4], 0  ;;  %s538_s0 = inlined_call_operand.hbm [shape: f32[8,20], index: 0, kind: input, shape index: {}]   ;;  %s539_s1 = inlined_call_operand.hbm [shape: f32[20,64], index: 1, kind: input, shape index: {}]   ;;  %s540_s2 = inlined_call_operand.vmem [shape: f32[1,64], index: 2, kind: input, shape index: {}]   ;;  %s541_s3 = inlined_call_operand.vmem [shape: f32[1,64], index: 3, kind: input, shape index: {}]   ;;  %s542_s4 = inlined_call_operand.<no memory space> [shape: f32[1], index: 4, kind: input, shape index: {}]   ;;  %s543_s5 = inlined_call_operand.hbm [shape: f32[1,8], index: 5, kind: output, shape index: {}]  }
   0x1   :  { %12 = vsyncpa [#allocation7], 0 }
   0x2   :  { %13 = vsyncpa [#allocation5], 0 }
   0x3   :  { %17 = vsyncadd [#allocation4], 1920  ;;  %s18_s20 = sshll.u32 %s538_s0, 4  ;;  %s452_s21 = smov [#allocation3]   ;;  %s19_s20 = int_to_ptr.hbm [resolvable:$true] %s18_s20 }
   0x4   :  { %s20_s22 = sshll.u32 %s452_s21, 4  ;;  %s31_s25 = sshll.u32 %s539_s1, 4  ;;  %s21_s22 = int_to_ptr.vmem [resolvable:$true] %s20_s22  ;;  %s32_s25 = int_to_ptr.hbm [resolvable:$true] %s31_s25 }
   0x5   :  { %s453_s26 = smov 128   ;;  %s454_s27 = smov 8  }
   0x6   :  { %26 = dma.hbm_to_vmem [thread:$0]  %s19_s20, 128, %s21_s22, [#allocation4], %s453_s26, %s453_s26, %s454_s27  }
   0x7   :  { %s455_s28 = smov [#allocation6]  }
   0x8   :  { %s33_s29 = sshll.u32 %s455_s28, 4  ;;  %s34_s29 = int_to_ptr.vmem [resolvable:$true] %s33_s29 }
   0x9   :  { %39 = dma.hbm_to_vmem [thread:$0]  %s32_s25, 384, %s34_s29, [#allocation7], %s453_s26, %s453_s26, %s454_s27  }
   0xa   :  { %446 = dma.done.wait [#allocation4], 2048  }
   0xb   :  { %447 = vsyncadd [#allocation4], 4294965248 }
   0xc   :  { %448 = dma.done.wait [#allocation7], 384  }
   0xd   :  { %449 = vsyncadd [#allocation7], 4294966912  ;;  %vm126_vm0 = vcmask 1043456   ;;  %v72_v0 = vld [vmem:[#allocation6 + $0x10] sm:$0xf]  ;;  %v71_v1 = vld [vmem:[#allocation6 + $0x8] sm:$0xff] }
   0xe   :  { %358 = vmatpush.msk.msra.mxu2 %vm126_vm0, %v72_v0  ;;  %359 = vmatpush.msk.msra.mxu3 %vm126_vm0, %v72_v0  ;;  %v70_v2 = vld [vmem:[#allocation6] sm:$0xff]  ;;  %v60_v3 = vld [vmem:[#allocation3 + $0x30] sm:$0xff]  ;;  %vm77_vm1 = vcmask 162816   ;;  %v61_v6 = vld [vmem:[#allocation3 + $0x38] sm:$0xff]  ;;  %vm214_vm2 = vcmask 523264  }
   0xf   :  { %324 = vmatpush.msk.msra.mxu0 %vm126_vm0, %v72_v0  ;;  %v66_v4 = vld [vmem:[#allocation3 + $0x60] sm:$0xff]  ;;  %v67_v7 = vld [vmem:[#allocation3 + $0x68] sm:$0xff]  ;;  %v68_v10 = vld [vmem:[#allocation3 + $0x70] sm:$0xff] }
  0x10   :  { %360 = vmatpush.msra.mxu2 %v71_v1  ;;  %361 = vmatpush.msra.mxu3 %v71_v1  ;;  %v54_v5 = vld [vmem:[#allocation3] sm:$0xff]  ;;  %v55_v8 = vld [vmem:[#allocation3 + $0x8] sm:$0xff]  ;;  %v56_v11 = vld [vmem:[#allocation3 + $0x10] sm:$0xff] }
  0x11   :  { %144 = vmatpush.msra.mxu0 %v71_v1  ;;  %v62_v9 = vld [vmem:[#allocation3 + $0x40] sm:$0xff]  ;;  %v63_v12 = vld [vmem:[#allocation3 + $0x48] sm:$0xff]  ;;  %v69_v13 = vld [vmem:[#allocation3 + $0x78] sm:$0xff] }
  0x12   :  { %362 = vmatpush.msra.mxu2 %v70_v2  ;;  %363 = vmatpush.msra.mxu3 %v70_v2  ;;  %v57_v14 = vld [vmem:[#allocation3 + $0x18] sm:$0xff]  ;;  %v64_v15 = vld [vmem:[#allocation3 + $0x50] sm:$0xff]  ;;  %v58_v16 = vld [vmem:[#allocation3 + $0x20] sm:$0xff] }
  0x13   :  { %331 = vmatmul.msk.f32.vlgmr.msra.gmra.mxu2 %vm77_vm1, %v60_v3  ;;  %337 = vmatmul.msk.f32.vlgmr.msra.gmra.mxu3 %vm77_vm1, %v66_v4  ;;  %v65_v17 = vld [vmem:[#allocation3 + $0x58] sm:$0xff]  ;;  %v59_v18 = vld [vmem:[#allocation3 + $0x28] sm:$0xff]  ;;  %v369_v27 = vld [vmem:[%s540_s2] ss:$0 sm:$0xff] }
  0x14   :  { %145 = vmatpush.msra.mxu0 %v70_v2  ;;  %v211_v4 = vld [vmem:[%s541_s3] sm:$0x1]  ;;  %s456_s3 = smov [#allocation8]  }
  0x15   :  { %325 = vmatmul.msk.f32.vlgmr.msra.gmra.mxu0 %vm77_vm1, %v54_v5  ;;  %v213_v5 = vstv %s542_s4  ;;  %s311_s8 = sshll.u32 %s456_s3, 4  ;;  %s313_s4 = sshll.u32 %s543_s5, 4  ;;  %s312_s8 = int_to_ptr.vmem [resolvable:$true] %s311_s8  ;;  %s314_s4 = int_to_ptr.hbm [resolvable:$true] %s313_s4 }
  0x1b   :  { %332 = vmatmul.msk.f32.gmra.mxu2 %vm77_vm1, %v61_v6  ;;  %338 = vmatmul.msk.f32.gmra.mxu3 %vm77_vm1, %v67_v7 }
  0x1d   :  { %326 = vmatmul.msk.f32.gmra.mxu0 %vm77_vm1, %v55_v8 }
  0x23   :  { %333 = vmatmul.msk.f32.gmra.mxu2 %vm77_vm1, %v62_v9  ;;  %339 = vmatmul.msk.f32.gmra.mxu3 %vm77_vm1, %v68_v10 }
  0x25   :  { %327 = vmatmul.msk.f32.gmra.mxu0 %vm77_vm1, %v56_v11 }
  0x2b   :  { %334 = vmatmul.msk.f32.gmra.mxu2 %vm77_vm1, %v63_v12  ;;  %340 = vmatmul.msk.f32.gmra.mxu3 %vm77_vm1, %v69_v13 }
  0x2d   :  { %328 = vmatmul.msk.f32.gmra.mxu0 %vm77_vm1, %v57_v14 }
  0x33   :  { %335 = vmatmul.msk.f32.gmra.mxu2 %vm77_vm1, %v64_v15 }
  0x35   :  { %329 = vmatmul.msk.f32.gmra.mxu0 %vm77_vm1, %v58_v16 }
  0x3b   :  { %336 = vmatmul.msk.f32.gmra.mxu2 %vm77_vm1, %v65_v17 }
  0x3d   :  { %330 = vmatmul.msk.f32.gmra.mxu0 %vm77_vm1, %v59_v18 }
  0x92   :  { %v147_v21 = vpop.f32.mrf.mxu0 }
  0x93   :  { %v148_v1 = vadd.f32 %v369_v27, %v147_v21 }
  0x95   :  { %v195_v3 = vmax.f32 %v148_v1, 0.0 }
  0x96   :  { %v165_v19 = vpop.f32.mrf.mxu2  ;;  %v183_v20 = vpop.f32.mrf.mxu3 }
  0x97   :  { %v184_v37 = vadd.f32 %v369_v27, %v183_v20  ;;  %v166_v53 = vadd.f32 %v369_v27, %v165_v19 }
  0x99   :  { %v207_v40 = vmax.f32 %v184_v37, 0.0  ;;  %v201_v56 = vmax.f32 %v166_v53, 0.0 }
  0x9a   :  { %v150_v26 = vpop.f32.mrf.mxu0 }
  0x9b   :  { %v151_v63 = vadd.f32 %v369_v27, %v150_v26 }
  0x9d   :  { %v196_v2 = vmax.f32 %v151_v63, 0.0 }
  0x9e   :  { %v168_v22 = vpop.f32.mrf.mxu2  ;;  %v186_v23 = vpop.f32.mrf.mxu3 }
  0x9f   :  { %v187_v34 = vadd.f32 %v369_v27, %v186_v23  ;;  %v169_v50 = vadd.f32 %v369_v27, %v168_v22 }
  0xa1   :  { %v208_v38 = vmax.f32 %v187_v34, 0.0  ;;  %v202_v54 = vmax.f32 %v169_v50, 0.0 }
  0xa2   :  { %v153_v33 = vpop.f32.mrf.mxu0 }
  0xa3   :  { %v154_v61 = vadd.f32 %v369_v27, %v153_v33 }
  0xa5   :  { %v197_v0 = vmax.f32 %v154_v61, 0.0 }
  0xa6   :  { %v171_v24 = vpop.f32.mrf.mxu2  ;;  %v189_v25 = vpop.f32.mrf.mxu3 }
  0xa7   :  { %v190_v31 = vadd.f32 %v369_v27, %v189_v25  ;;  %v172_v48 = vadd.f32 %v369_v27, %v171_v24 }
  0xa9   :  { %v209_v35 = vmax.f32 %v190_v31, 0.0  ;;  %v203_v51 = vmax.f32 %v172_v48, 0.0 }
  0xaa   :  { %v156_v39 = vpop.f32.mrf.mxu0 }
  0xab   :  { %v157_v59 = vadd.f32 %v369_v27, %v156_v39 }
  0xad   :  { %v198_v62 = vmax.f32 %v157_v59, 0.0 }
  0xae   :  { %v174_v28 = vpop.f32.mrf.mxu2  ;;  %v192_v29 = vpop.f32.mrf.mxu3 }
  0xaf   :  { %v193_v30 = vadd.f32 %v369_v27, %v192_v29  ;;  %v175_v45 = vadd.f32 %v369_v27, %v174_v28 }
  0xb1   :  { %v210_v32 = vmax.f32 %v193_v30, 0.0  ;;  %v204_v49 = vmax.f32 %v175_v45, 0.0 }
  0xb2   :  { %v159_v47 = vpop.f32.mrf.mxu0 }
  0xb3   :  { %341 = vmatpush.xpose.msk.msra.mxu1 %vm214_vm2, %v210_v32  ;;  %v160_v58 = vadd.f32 %v369_v27, %v159_v47 }
  0xb5   :  { %v199_v60 = vmax.f32 %v160_v58, 0.0 }
  0xb6   :  { %v177_v36 = vpop.f32.mrf.mxu2 }
  0xb7   :  { %342 = vmatpush.xpose.msk.msra.mxu1 %vm214_vm2, %v209_v35  ;;  %v178_v43 = vadd.f32 %v369_v27, %v177_v36 }
  0xb9   :  { %v205_v46 = vmax.f32 %v178_v43, 0.0 }
  0xba   :  { %v162_v52 = vpop.f32.mrf.mxu0 }
  0xbb   :  { %343 = vmatpush.xpose.msk.msra.mxu1 %vm214_vm2, %v208_v38  ;;  %v163_v55 = vadd.f32 %v369_v27, %v162_v52 }
  0xbd   :  { %v200_v57 = vmax.f32 %v163_v55, 0.0 }
  0xbe   :  { %v180_v41 = vpop.f32.mrf.mxu2 }
  0xbf   :  { %v181_v42 = vadd.f32 %v369_v27, %v180_v41  ;;  %344 = vmatpush.xpose.msk.msra.mxu1 %vm214_vm2, %v207_v40 }
  0xc1   :  { %v206_v44 = vmax.f32 %v181_v42, 0.0 }
  0xc3   :  { %345 = vmatpush.xpose.msk.msra.mxu1 %vm214_vm2, %v206_v44 }
  0xc7   :  { %346 = vmatpush.xpose.msk.msra.mxu1 %vm214_vm2, %v205_v46 }
  0xcb   :  { %347 = vmatpush.xpose.msk.msra.mxu1 %vm214_vm2, %v204_v49 }
  0xcf   :  { %348 = vmatpush.xpose.msk.msra.mxu1 %vm214_vm2, %v203_v51 }
  0xd3   :  { %349 = vmatpush.xpose.msk.msra.mxu1 %vm214_vm2, %v202_v54 }
  0xd7   :  { %350 = vmatpush.xpose.msk.msra.mxu1 %vm214_vm2, %v201_v56 }
  0xdb   :  { %351 = vmatpush.xpose.msk.msra.mxu1 %vm214_vm2, %v200_v57 }
  0xdf   :  { %352 = vmatpush.xpose.msk.msra.mxu1 %vm214_vm2, %v199_v60 }
  0xe3   :  { %353 = vmatpush.xpose.msk.msra.mxu1 %vm214_vm2, %v198_v62 }
  0xe7   :  { %354 = vmatpush.xpose.msk.msra.mxu1 %vm214_vm2, %v197_v0 }
  0xeb   :  { %355 = vmatpush.xpose.msk.msra.mxu1 %vm214_vm2, %v196_v2 }
  0xef   :  { %356 = vmatpush.xpose.msk.msra.mxu1 %vm214_vm2, %v195_v3 }
  0xf2   :  { %357 = vmatmul.msk.f32.vlgmr.msra.gmra.mxu1 %vm214_vm2, %v211_v4 }
 0x16f   :  { %v283_v6 = vpop.f32.mrf.mxu1 }
 0x170   :  { %v284_v7 = vadd.f32 %v283_v6, %v213_v5 }
 0x172   :  { %v286_v8 = vsub.f32 0.0, %v284_v7 }
 0x174   :  { %v287_v9 = vmul.f32 1.442695, %v286_v8 }
 0x176   :  { %370 = vpow2.f32 %v287_v9 }
 0x17c   :  { %v371_v10 = vpop.eup %370 }
 0x17d   :  { %v289_v11 = vadd.f32 1.0, %v371_v10 }
 0x17f   :  { %372 = vrcp.f32 %v289_v11  ;;  %v301_v15 = vand.u32 2147483648, %v289_v11  ;;  %v299_v17 = vand.u32 2147483647, %v289_v11  ;;  %vm295_vm4 = vweird.f32 %v289_v11 }
 0x181   :  { %v302_v19 = vor.u32 1.1754944e-38, %v301_v15  ;;  %vm300_vm6 = vcmp.eq.f32.partialorder %v299_v17, 8.507059e+37 }
 0x185   :  { %v373_v12 = vpop.eup %372 }
 0x186   :  { %v291_v13 = vmul.f32 %v373_v12, %v289_v11  ;;  %vm296_vm3 = vweird.f32 %v373_v12 }
 0x187   :  { %vm297_vm5 = vmor %vm295_vm4, %vm296_vm3 }
 0x188   :  { %v292_v14 = vsub.f32 1.0, %v291_v13 }
 0x18a   :  { %v293_v16 = vmul.f32 %v373_v12, %v292_v14 }
 0x18c   :  { %v294_v18 = vadd.f32 %v373_v12, %v293_v16 }
 0x18e   :  { %v298_v20 = vsel %vm297_vm5, %v373_v12, %v294_v18 }
 0x18f   :  { %v303_v21 = vsel %vm300_vm6, %v302_v19, %v298_v20 }
 0x190   :  { %305 = vst [vmem:[#allocation8] sm:$0x1] %v303_v21 }
 0x191   :  { %316 = dma.vmem_to_hbm [thread:$0]  %s312_s8, 16, %s314_s4, [#allocation5]  }
 0x192   :  { %450 = dma.done.wait [#allocation5], 16  }
 0x193   :  { %451 = vsyncadd [#allocation5], 4294967280 }
 0x194   :  { %321 = vsyncpa [#allocation4], 1 }
 0x195   :  { %322 = vsyncpa [#allocation7], 1 }
 0x196   :  { %323 = vsyncpa [#allocation5], 1 }

</bundles_post_ra>
